<compile_context>
chip_gen: v7x
topology: tpu7x:2x2x1
jax: 0.10.0
libtpu: 0.0.40
codegen_flags: <defaults>
</compile_context>

<pallas_src>
import functools

import jax
import jax.numpy as jnp
from jax import lax
from jax.experimental import pallas as pl
from jax.experimental.pallas import tpu as pltpu

EPS = 1e-6


# --------------------------------------------------------------------------- #
# VMEM / tile sizing (generation aware)
# --------------------------------------------------------------------------- #
def _vmem_params():
    """(vmem_limit_bytes, tile_budget_bytes, per_step_floor_bytes)."""
    try:
        cap = int(pltpu.get_tpu_info().vmem_capacity_bytes)
    except Exception:
        cap = 64 << 20  # conservative default (v7x per-TensorCore VMEM)
    # Leave ~25% headroom for compiler-internal scratch; never exceed 96 MiB.
    limit = max(32 << 20, min((cap * 3) // 4, 96 << 20))
    budget = limit - (4 << 20)
    # Per-grid-step HBM bytes (per direction) needed to amortize the ~0.35 us
    # fixed per-step cost; higher-BW chips (v7x, small VMEM) need bigger steps.
    floor = (4 << 20) if cap <= (64 << 20) else (2 << 20)
    return limit, budget, floor


def _resident_bytes_per_lane(B, itemsize):
    # 2x input double-buffer + 2x output double-buffer (x dtype) + ~2 f32 temps.
    return B * (4 * itemsize + 2 * 4)


def _pick_tile_h(B, H_pad, itemsize, budget, per_step_floor):
    """Hidden-dim tile: multiple of 128, divisor of H_pad, as large as VMEM allows."""
    bytes_per_lane = _resident_bytes_per_lane(B, itemsize)
    th = min(H_pad, max(128, (budget // bytes_per_lane) // 128 * 128))
    # Prefer >= 4 grid programs (v7x megacore sharding + pipeline steady state),
    # but only if that keeps per-step HBM bytes above the floor.
    if H_pad // th < 4:
        cand = max(128, (H_pad // 4) // 128 * 128)
        if cand * B * itemsize >= per_step_floor:
            th = min(th, cand)
    th = max(128, (th // 128) * 128)
    while H_pad % th != 0:  # need an exact divisor; 128 always works
        th -= 128
    return th


def _pick_two_pass_tiles(B, H_pad, itemsize, budget):
    ths = max(128, (min(H_pad, 512) // 128) * 128)
    while H_pad % ths != 0:
        ths -= 128
    per_row = ths * (4 * itemsize + 2 * 4)
    tb = budget // per_row
    if B <= 8:
        tb = B  # full-extent first dim is always a legal block shape
    else:
        tb = max(8, min(tb, B, 2048))
        tb = (tb // 8) * 8
    return ths, tb


# --------------------------------------------------------------------------- #
# Resident-batch path: whole batch in VMEM, grid over hidden tiles.
# --------------------------------------------------------------------------- #
def _bn_resident_kernel(x_ref, gamma_ref, beta_ref, o_ref):
    b = x_ref.shape[0]
    # Pass 1: per-column mean (stream x through the sublane reduce).
    mean = jnp.sum(x_ref[...].astype(jnp.float32), axis=0, keepdims=True) * (1.0 / b)
    # Pass 2: numerically-stable unbiased variance (re-read x from VMEM).
    d = x_ref[...].astype(jnp.float32) - mean
    var = jnp.sum(d * d, axis=0, keepdims=True) * (1.0 / (b - 1))
    inv_std = lax.rsqrt(var + EPS)
    scale = gamma_ref[...].astype(jnp.float32) * inv_std
    shift = beta_ref[...].astype(jnp.float32) - mean * scale
    # Pass 3: fused normalize + affine (re-read x; cast fused into the FMA).
    o_ref[...] = (x_ref[...].astype(jnp.float32) * scale + shift).astype(o_ref.dtype)


def _batch_norm_resident(x, gamma2, beta2, limit, budget, floor):
    B, H = x.shape
    th = _pick_tile_h(B, H, x.dtype.itemsize, budget, floor)
    return pl.pallas_call(
        _bn_resident_kernel,
        out_shape=jax.ShapeDtypeStruct((B, H), x.dtype),
        grid_spec=pl.GridSpec(
            grid=(H // th,),
            in_specs=[
                pl.BlockSpec((B, th), lambda j: (0, j)),   # x tile (full batch)
                pl.BlockSpec((1, th), lambda j: (0, j)),   # gamma tile
                pl.BlockSpec((1, th), lambda j: (0, j)),   # beta tile
            ],
            out_specs=pl.BlockSpec((B, th), lambda j: (0, j)),
        ),
        compiler_params=pltpu.CompilerParams(
            dimension_semantics=("parallel",),
            vmem_limit_bytes=limit,
        ),
    )(x, gamma2, beta2)


# --------------------------------------------------------------------------- #
# Large-B fallback: streaming stats (Chan/Welford combine) + elementwise apply.
# --------------------------------------------------------------------------- #
def _bn_stats_kernel(x_ref, mean_out_ref, var_out_ref, mean_sc, m2_sc, *,
                     total_b, tile_b):
    k = pl.program_id(1)
    nb = pl.num_programs(1)

    @pl.when(k == 0)
    def _():
        mean_sc[...] = jnp.zeros_like(mean_sc)
        m2_sc[...] = jnp.zeros_like(m2_sc)

    x = x_ref[...].astype(jnp.float32)                        # (tile_b, ths)
    remaining = total_b - k * tile_b
    n_prev = (k * tile_b) * jnp.float32(1.0)
    n_cur = jnp.minimum(tile_b, remaining).astype(jnp.float32)

    row = lax.broadcasted_iota(jnp.int32, x.shape, 0)
    valid = row < remaining                                   # mask partial last tile

    xm = jnp.where(valid, x, 0.0)
    tile_mean = jnp.sum(xm, axis=0, keepdims=True) / n_cur
    d = jnp.where(valid, x - tile_mean, 0.0)
    tile_m2 = jnp.sum(d * d, axis=0, keepdims=True)

    n_tot = n_prev + n_cur
    delta = tile_mean - mean_sc[...]
    mean_sc[...] = mean_sc[...] + delta * (n_cur / n_tot)
    m2_sc[...] = m2_sc[...] + tile_m2 + (delta * delta) * (n_prev * n_cur / n_tot)

    @pl.when(k == nb - 1)
    def _():
        mean_out_ref[...] = mean_sc[...]
        var_out_ref[...] = m2_sc[...] * (1.0 / (total_b - 1))  # unbiased


def _bn_apply_kernel(x_ref, mean_ref, var_ref, gamma_ref, beta_ref, o_ref):
    mean = mean_ref[...]
    inv_std = lax.rsqrt(var_ref[...] + EPS)
    scale = gamma_ref[...].astype(jnp.float32) * inv_std
    shift = beta_ref[...].astype(jnp.float32) - mean * scale
    o_ref[...] = (x_ref[...].astype(jnp.float32) * scale + shift).astype(o_ref.dtype)


def _batch_norm_two_pass(x, gamma2, beta2, limit, budget):
    B, H = x.shape
    ths, tb = _pick_two_pass_tiles(B, H, x.dtype.itemsize, budget)
    nb = pl.cdiv(B, tb)

    mean, var = pl.pallas_call(
        functools.partial(_bn_stats_kernel, total_b=B, tile_b=tb),
        out_shape=(jax.ShapeDtypeStruct((1, H), jnp.float32),
                   jax.ShapeDtypeStruct((1, H), jnp.float32)),
        grid_spec=pltpu.PrefetchScalarGridSpec(
            num_scalar_prefetch=0,
            grid=(H // ths, nb),
            in_specs=[pl.BlockSpec((tb, ths), lambda j, k: (k, j))],
            out_specs=[pl.BlockSpec((1, ths), lambda j, k: (0, j)),
                       pl.BlockSpec((1, ths), lambda j, k: (0, j))],
            scratch_shapes=[pltpu.VMEM((1, ths), jnp.float32),
                            pltpu.VMEM((1, ths), jnp.float32)],
        ),
        compiler_params=pltpu.CompilerParams(
            dimension_semantics=("parallel", "arbitrary"),
            vmem_limit_bytes=limit,
        ),
    )(x)

    return pl.pallas_call(
        _bn_apply_kernel,
        out_shape=jax.ShapeDtypeStruct((B, H), x.dtype),
        grid_spec=pl.GridSpec(
            grid=(H // ths, nb),
            in_specs=[
                pl.BlockSpec((tb, ths), lambda j, k: (k, j)),
                pl.BlockSpec((1, ths), lambda j, k: (0, j)),
                pl.BlockSpec((1, ths), lambda j, k: (0, j)),
                pl.BlockSpec((1, ths), lambda j, k: (0, j)),
                pl.BlockSpec((1, ths), lambda j, k: (0, j)),
            ],
            out_specs=pl.BlockSpec((tb, ths), lambda j, k: (k, j)),
        ),
        compiler_params=pltpu.CompilerParams(
            dimension_semantics=("parallel", "parallel"),
            vmem_limit_bytes=limit,
        ),
    )(x, mean, var, gamma2, beta2)


# --------------------------------------------------------------------------- #
# Public wrapper
# --------------------------------------------------------------------------- #
def batch_norm(x, gamma, beta, *, force_two_pass=False):
    """x: (B, H); gamma, beta: (H,). Returns gamma*(x-mean)/sqrt(var+eps)+beta."""
    B, H = x.shape
    if B < 2:
        # torch.var(dim=0) with default correction=1 is NaN for B == 1.
        raise ValueError("BatchNormalization needs batch size >= 2 (unbiased variance).")

    limit, budget, floor = _vmem_params()
    itemsize = x.dtype.itemsize

    # Pad the hidden dim to a multiple of 128 -> lane-dense unmasked stores,
    # real tiled grid. Output is sliced back afterwards.
    H_pad = ((H + 127) // 128) * 128
    if H_pad != H:
        x = jnp.pad(x, ((0, 0), (0, H_pad - H)))
        gamma = jnp.pad(gamma, (0, H_pad - H), constant_values=1.0)
        beta = jnp.pad(beta, (0, H_pad - H), constant_values=0.0)
    gamma2 = gamma.reshape(1, H_pad)
    beta2 = beta.reshape(1, H_pad)

    resident_ok = _resident_bytes_per_lane(B, itemsize) * 128 <= budget
    if resident_ok and not force_two_pass:
        out = _batch_norm_resident(x, gamma2, beta2, limit, budget, floor)
    else:
        out = _batch_norm_two_pass(x, gamma2, beta2, limit, budget)

    return out[:, :H] if H_pad != H else out


def batch_norm_ref(x, gamma, beta):
    mean = jnp.mean(x, axis=0)
    var = jnp.var(x, axis=0, ddof=1)  # unbiased, matches torch.var default
    return gamma * (x - mean) / jnp.sqrt(var + EPS) + beta


if __name__ == "__main__":
    key = jax.random.PRNGKey(0)

    # 1) Main resident-batch path, lane-aligned hidden dim.
    B, H = 8, 256
    x = jax.random.normal(key, (B, H), dtype=jnp.float32)
    gamma = jnp.ones((H,), dtype=jnp.float32)
    beta = jnp.zeros((H,), dtype=jnp.float32)
    out = jax.block_until_ready(batch_norm(x, gamma, beta))
    assert out.shape == (B, H)
    assert jnp.allclose(out, batch_norm_ref(x, gamma, beta), atol=1e-5, rtol=1e-5)

    # 2) Hidden dim not a multiple of 128 -> pad-and-slice path.
    B2, H2 = 10, 200
    k1, k2 = jax.random.split(key)
    x2 = jax.random.normal(k1, (B2, H2), dtype=jnp.float32) * 2.0 + 1.5
    g2 = jax.random.normal(k2, (H2,), dtype=jnp.float32) * 0.1 + 1.0
    b2 = jax.random.normal(k2, (H2,), dtype=jnp.float32) * 0.1
    out2 = jax.block_until_ready(batch_norm(x2, g2, b2))
    assert out2.shape == (B2, H2)
    assert jnp.allclose(out2, batch_norm_ref(x2, g2, b2), atol=1e-4, rtol=1e-4)

    # 3) Exercise the large-B two-pass fallback (streaming stats + apply).
    out3 = jax.block_until_ready(batch_norm(x2, g2, b2, force_two_pass=True))
    assert jnp.allclose(out3, batch_norm_ref(x2, g2, b2), atol=1e-4, rtol=1e-4)

    print("KERNEL_OK")
</pallas_src>

<mosaic_0001>
module attributes {stable_mosaic.version = 11 : i64} {
  func.func @_bn_resident_kernel(%arg0: i32, %arg1: memref<8x256xf32, #tpu.memory_space<vmem>>, %arg2: memref<1x256xf32, #tpu.memory_space<vmem>>, %arg3: memref<1x256xf32, #tpu.memory_space<vmem>>, %arg4: memref<8x256xf32, #tpu.memory_space<vmem>>) attributes {dimension_semantics = [#tpu.dimension_semantics<parallel>], iteration_bounds = array<i64: 1>, scalar_prefetch = 0 : i64, scratch_operands = 0 : i64, tpu.core_type = #tpu.core_type<tc>, window_params = [{transform_indices = @transform_0, window_bounds = array<i64: 8, 256>}, {transform_indices = @transform_1, window_bounds = array<i64: 1, 256>}, {transform_indices = @transform_2, window_bounds = array<i64: 1, 256>}, {transform_indices = @transform_3, window_bounds = array<i64: 8, 256>}]} {
    %c0 = arith.constant 0 : index
    %c0_0 = arith.constant 0 : index
    %0 = vector.load %arg1[%c0, %c0_0] : memref<8x256xf32, #tpu.memory_space<vmem>>, vector<8x256xf32>
    %cst = arith.constant dense<0.000000e+00> : vector<256xf32>
    %1 = vector.multi_reduction <add>, %0, %cst [0] : vector<8x256xf32> to vector<256xf32>
    %2 = vector.shape_cast %1 : vector<256xf32> to vector<1x256xf32>
    %cst_1 = arith.constant 1.250000e-01 : f32
    %3 = vector.broadcast %cst_1 : f32 to vector<1x256xf32>
    %4 = arith.mulf %2, %3 : vector<1x256xf32>
    %c0_2 = arith.constant 0 : index
    %c0_3 = arith.constant 0 : index
    %5 = vector.load %arg1[%c0_2, %c0_3] : memref<8x256xf32, #tpu.memory_space<vmem>>, vector<8x256xf32>
    %6 = vector.broadcast %4 : vector<1x256xf32> to vector<8x256xf32>
    %7 = arith.subf %5, %6 : vector<8x256xf32>
    %8 = arith.mulf %7, %7 : vector<8x256xf32>
    %cst_4 = arith.constant dense<0.000000e+00> : vector<256xf32>
    %9 = vector.multi_reduction <add>, %8, %cst_4 [0] : vector<8x256xf32> to vector<256xf32>
    %10 = vector.shape_cast %9 : vector<256xf32> to vector<1x256xf32>
    %cst_5 = arith.constant 0.142857149 : f32
    %11 = vector.broadcast %cst_5 : f32 to vector<1x256xf32>
    %12 = arith.mulf %10, %11 : vector<1x256xf32>
    %cst_6 = arith.constant 9.99999997E-7 : f32
    %13 = vector.broadcast %cst_6 : f32 to vector<1x256xf32>
    %14 = arith.addf %12, %13 : vector<1x256xf32>
    %15 = math.rsqrt %14 : vector<1x256xf32>
    %c0_7 = arith.constant 0 : index
    %c0_8 = arith.constant 0 : index
    %16 = vector.load %arg2[%c0_7, %c0_8] : memref<1x256xf32, #tpu.memory_space<vmem>>, vector<1x256xf32>
    %17 = arith.mulf %16, %15 : vector<1x256xf32>
    %c0_9 = arith.constant 0 : index
    %c0_10 = arith.constant 0 : index
    %18 = vector.load %arg3[%c0_9, %c0_10] : memref<1x256xf32, #tpu.memory_space<vmem>>, vector<1x256xf32>
    %19 = arith.mulf %4, %17 : vector<1x256xf32>
    %20 = arith.subf %18, %19 : vector<1x256xf32>
    %c0_11 = arith.constant 0 : index
    %c0_12 = arith.constant 0 : index
    %21 = vector.load %arg1[%c0_11, %c0_12] : memref<8x256xf32, #tpu.memory_space<vmem>>, vector<8x256xf32>
    %22 = vector.broadcast %17 : vector<1x256xf32> to vector<8x256xf32>
    %23 = arith.mulf %21, %22 : vector<8x256xf32>
    %24 = vector.broadcast %20 : vector<1x256xf32> to vector<8x256xf32>
    %25 = arith.addf %23, %24 : vector<8x256xf32>
    %c0_13 = arith.constant 0 : index
    %c0_14 = arith.constant 0 : index
    %26 = vector.load %arg4[%c0_13, %c0_14] : memref<8x256xf32, #tpu.memory_space<vmem>>, vector<8x256xf32>
    tpu.vector_store %arg4[%c0_13, %c0_14], %25 {strides = array<i32>} : memref<8x256xf32, #tpu.memory_space<vmem>>, vector<8x256xf32>,
    return
  }
  func.func @transform_0(%arg0: i32) -> (i32, i32) {
    %c0_i32 = arith.constant 0 : i32
    %c0_i32_0 = arith.constant 0 : i32
    return %c0_i32, %arg0 : i32, i32
  }
  func.func @transform_1(%arg0: i32) -> (i32, i32) {
    %c0_i32 = arith.constant 0 : i32
    %c0_i32_0 = arith.constant 0 : i32
    return %c0_i32, %arg0 : i32, i32
  }
  func.func @transform_2(%arg0: i32) -> (i32, i32) {
    %c0_i32 = arith.constant 0 : i32
    %c0_i32_0 = arith.constant 0 : i32
    return %c0_i32, %arg0 : i32, i32
  }
  func.func @transform_3(%arg0: i32) -> (i32, i32) {
    %c0_i32 = arith.constant 0 : i32
    %c0_i32_0 = arith.constant 0 : i32
    return %c0_i32, %arg0 : i32, i32
  }
}

</mosaic_0001>

<bundles_post_ra>
// kernel: tpu_custom_call.1
= control target key start
LH: loop header
LB: loop body
LE: loop exit
PB: predicated region body
PF: predicated region fallthrough
CT: control target
= control target key end

     0   :  { %8 = vsyncpa [#allocation3], 0  ;;  %s258_s0 = inlined_call_operand.hbm [shape: f32[8,256], index: 0, kind: input, shape index: {}]   ;;  %s259_s1 = inlined_call_operand.vmem [shape: f32[1,256], index: 1, kind: input, shape index: {}]   ;;  %s260_s2 = inlined_call_operand.vmem [shape: f32[1,256], index: 2, kind: input, shape index: {}]   ;;  %s261_s3 = inlined_call_operand.hbm [shape: f32[8,256], index: 3, kind: output, shape index: {}]  }
   0x1   :  { %9 = vsyncpa [#allocation4], 0  ;;  %s205_s12 = smov [#allocation2]   ;;  %s157_s16 = scalar_lea.hbm %s258_s0, 256 }
   0x2   :  { %s16_s13 = sshll.u32 %s205_s12, 4  ;;  %p158_p0 = scmp.ne.s32.totalorder %s258_s0, %s157_s16  ;;  %s17_s13 = int_to_ptr.vmem [resolvable:$true] %s16_s13 }
   0x3   :  { %p161_p1 = scmp.lt.u32.totalorder %s157_s16, %s258_s0 }
   0x5   :  { %p163_p2 = pnand %p161_p1, %p158_p0 }
   0x7   :  { %166 = shalt.err (!%p163_p2)
}
   0x8   :  { %s167_s21 = scalar_lea.vmem %s17_s13, 256  ;;  %p172_p4 = scmp.lt.s32.totalorder %s17_s13, %s17_s13 }
   0x9   :  { %p168_p3 = scmp.ne.s32.totalorder %s17_s13, %s167_s21  ;;  %p173_p5 = scmp.lt.s32.totalorder %s167_s21, %s167_s21 }
   0xb   :  { %p174_p6 = por %p173_p5, %p172_p4 }
   0xd   :  { %p175_p7 = pnand %p174_p6, %p168_p3 }
   0xf   :  { %178 = shalt.err (!%p175_p7)
}
  0x10   :  { %19 = dma.hbm_to_vmem [thread:$0]  %s258_s0, 256, %s17_s13, [#allocation3]  }
  0x11   :  { %201 = dma.done.wait [#allocation3], 256  }
  0x12   :  { %202 = vsyncadd [#allocation3], 4294967040  ;;  %v27_v0 = vld [vmem:[#allocation2] sm:$0xff]  ;;  %v28_v1 = vld [vmem:[#allocation2 + $0x8] sm:$0xff]  ;;  %v206_v36 = vmov 1966171168   ;;  %v72_v38 = vlaneseq }
  0x13   :  { %v29_v2 = vrot.slane %v27_v0, 4  ;;  %v35_v3 = vrot.slane %v28_v1, 4  ;;  %v70_v37 = vunpack.c.l.s4 %v206_v36  ;;  %v65_v46 = vld [vmem:[%s259_s1] sm:$0x3]  ;;  %s207_s27 = smov [#allocation5]  }
  0x14   :  { %v73_v40 = vshrl.u32 %v72_v38, 7  ;;  %v85_v57 = vld [vmem:[%s260_s2] sm:$0x3]  ;;  %s141_s1 = sshll.u32 %s207_s27, 4  ;;  %s142_s1 = int_to_ptr.vmem [resolvable:$true] %s141_s1 }
  0x15   :  { %v30_v4 = vadd.f32 %v29_v2, %v27_v0  ;;  %v36_v5 = vadd.f32 %v35_v3, %v28_v1  ;;  %v71_v39 = vunpack.c.0.s8 %v70_v37  ;;  %s179_s28 = scalar_lea.vmem %s142_s1, 256  ;;  %p184_p9 = scmp.lt.s32.totalorder %s142_s1, %s142_s1 }
  0x16   :  { %v89_v48 = vsub.s32 0, %v73_v40  ;;  %v93_v49 = vsub.s32 1, %v73_v40  ;;  %p180_p8 = scmp.ne.s32.totalorder %s142_s1, %s179_s28  ;;  %p185_p10 = scmp.lt.s32.totalorder %s179_s28, %s179_s28 }
  0x17   :  { %v31_v6 = vrot.slane %v30_v4, 2  ;;  %v37_v7 = vrot.slane %v36_v5, 2  ;;  %v74_v42 = vsub.s32 %v71_v39, %v73_v40 }
  0x18   :  { %p186_p11 = por %p185_p10, %p184_p9 }
  0x19   :  { %v32_v8 = vadd.f32 %v31_v6, %v30_v4  ;;  %v38_v9 = vadd.f32 %v37_v7, %v36_v5 }
  0x1a   :  { %p187_p12 = pnand %p186_p11, %p180_p8 }
  0x1b   :  { %v33_v10 = vrot.slane %v32_v8, 1  ;;  %v39_v11 = vrot.slane %v38_v9, 1 }
  0x1d   :  { %v34_v12 = vadd.f32 %v33_v10, %v32_v8  ;;  %v40_v13 = vadd.f32 %v39_v11, %v38_v9 }
  0x1f   :  { %v41_v14 = vmul.f32 0.125, %v34_v12  ;;  %v42_v15 = vmul.f32 0.125, %v40_v13 }
  0x21   :  { %v43_v16 = vsub.f32 %v27_v0, %v41_v14  ;;  %v44_v17 = vsub.f32 %v28_v1, %v42_v15 }
  0x23   :  { %v45_v18 = vmul.f32 %v43_v16, %v43_v16  ;;  %v46_v19 = vmul.f32 %v44_v17, %v44_v17 }
  0x25   :  { %v47_v20 = vrot.slane %v45_v18, 4  ;;  %v53_v21 = vrot.slane %v46_v19, 4 }
  0x27   :  { %v48_v22 = vadd.f32 %v47_v20, %v45_v18  ;;  %v54_v23 = vadd.f32 %v53_v21, %v46_v19 }
  0x29   :  { %v49_v24 = vrot.slane %v48_v22, 2  ;;  %v55_v25 = vrot.slane %v54_v23, 2 }
  0x2b   :  { %v50_v26 = vadd.f32 %v49_v24, %v48_v22  ;;  %v56_v27 = vadd.f32 %v55_v25, %v54_v23 }
  0x2d   :  { %v51_v28 = vrot.slane %v50_v26, 1  ;;  %v57_v29 = vrot.slane %v56_v27, 1 }
  0x2f   :  { %v52_v30 = vadd.f32 %v51_v28, %v50_v26  ;;  %v58_v31 = vadd.f32 %v57_v29, %v56_v27 }
  0x31   :  { %v59_v32 = vmul.f32 0.14285715, %v52_v30  ;;  %v60_v33 = vmul.f32 0.14285715, %v58_v31 }
  0x33   :  { %v61_v34 = vadd.f32 1e-06, %v59_v32  ;;  %v62_v35 = vadd.f32 1e-06, %v60_v33 }
  0x35   :  { %153 = vrsqrt.f32 %v61_v34 }
  0x36   :  { %155 = vrsqrt.f32 %v62_v35 }
  0x3f   :  { %v154_v41 = vpop.eup %153 }
  0x40   :  { %v156_v43 = vpop.eup %155 }
  0x41   :  { %v68_v44 = vcombine.low %v154_v41, %v156_v43 }
  0x43   :  { %v75_v45 = vrot.slane %v68_v44, %v74_v42 }
  0x45   :  { %v82_v47 = vrot.slane %v75_v45, %v74_v42 }
  0x47   :  { %v84_v50 = vmul.f32 %v82_v47, %v65_v46 }
  0x49   :  { %v90_v51 = vrot.slane %v84_v50, %v89_v48  ;;  %v94_v52 = vrot.slane %v84_v50, %v93_v49 }
  0x4b   :  { %v97_v53 = vmul.f32 %v90_v51, %v41_v14  ;;  %v98_v54 = vmul.f32 %v94_v52, %v42_v15  ;;  %v118_v60 = vmul.f32 %v90_v51, %v27_v0  ;;  %v119_v61 = vmul.f32 %v94_v52, %v28_v1 }
  0x4d   :  { %v101_v55 = vcombine.low %v97_v53, %v98_v54 }
  0x4f   :  { %v108_v56 = vrot.slane %v101_v55, %v74_v42 }
  0x51   :  { %v115_v58 = vrot.slane %v108_v56, %v74_v42 }
  0x53   :  { %v117_v59 = vsub.f32 %v85_v57, %v115_v58 }
  0x55   :  { %v124_v62 = vrot.slane %v117_v59, %v89_v48  ;;  %v128_v63 = vrot.slane %v117_v59, %v93_v49 }
  0x57   :  { %v131_v2 = vadd.f32 %v124_v62, %v118_v60  ;;  %v132_v3 = vadd.f32 %v128_v63, %v119_v61 }
  0x59   :  { %133 = vst [vmem:[#allocation5] sm:$0xff] %v131_v2  ;;  %134 = vst [vmem:[#allocation5 + $0x8] sm:$0xff] %v132_v3 }
  0x5a   :  { %190 = shalt.err (!%p187_p12)
}
  0x5b   :  { %s191_s30 = scalar_lea.hbm %s261_s3, 256 }
  0x5c   :  { %p192_p13 = scmp.ne.s32.totalorder %s261_s3, %s191_s30  ;;  %p195_p0 = scmp.lt.u32.totalorder %s191_s30, %s261_s3 }
  0x5e   :  { %p197_p1 = pnand %p195_p0, %p192_p13 }
  0x60   :  { %200 = shalt.err (!%p197_p1)
}
  0x61   :  { %144 = dma.vmem_to_hbm [thread:$0]  %s142_s1, 256, %s261_s3, [#allocation4]  }
  0x62   :  { %203 = dma.done.wait [#allocation4], 256  }
  0x63   :  { %204 = vsyncadd [#allocation4], 4294967040 }
  0x64   :  { %148 = vsyncpa [#allocation3], 1 }
  0x65   :  { %149 = vsyncpa [#allocation4], 1 }

</bundles_post_ra>
